<compile_context>
chip_gen: v5e
topology: v5e:2x2
jax: 0.10.0
libtpu: 0.0.40
codegen_flags: <defaults>
</compile_context>

<pallas_src>
import functools

import jax
import jax.numpy as jnp
from jax.experimental import pallas as pl
from jax.experimental.pallas import tpu as pltpu

_LANES = 128          # vreg lane width: last dim exactly lane-dense -> unmasked vst
_MAX_TILE_ROWS = 4096 # 4096 x 128 x 4B = 2 MiB per f32 buffer (8 MiB double-buffered i/o)


def _round_up(v, m):
    return -(-v // m) * m


def _gaussian_kernel(mean, neg_half_inv_var, x_ref, o_ref):
    # Upcast to f32 in-register (no-op for f32 inputs; required on v5e for bf16),
    # do the 3 VALU ops + 1 EUP exp, cast back to the output's native dtype.
    d = x_ref[...].astype(jnp.float32) - mean
    o_ref[...] = jnp.exp(neg_half_inv_var * (d * d)).astype(o_ref.dtype)


def gaussian_forward(x, mean, std):
    """Pallas implementation of Gaussian(mean, std)(x) for arbitrary-shaped x."""
    orig_shape = x.shape

    # Non-float inputs: PyTorch would promote; do it once here.
    if not jnp.issubdtype(x.dtype, jnp.floating):
        x = x.astype(jnp.float32)
    io_dtype = x.dtype
    n = x.size

    # --- wrapper-side layout plumbing: lane-dense (rows, 128) slab ---------------
    rows = -(-n // _LANES)                       # ceil(n / 128)
    pad = rows * _LANES - n                      # <= 127 elements, usually 0

    x_flat = jnp.ravel(x)                        # contiguous reshape: free
    if pad:
        x_flat = jnp.pad(x_flat, (0, pad))       # only the tiny tail, rare case
    x2 = x_flat.reshape(rows, _LANES)

    # --- tile sizing: multiple of 8 sublanes, <= _MAX_TILE_ROWS, >= 2 grid steps
    # for anything beyond a single sublane-tile so v7x megacore can split the work.
    if rows <= 8:
        tile_rows = 8
    else:
        tile_rows = min(_MAX_TILE_ROWS, _round_up(-(-rows // 2), 8))
    grid = (pl.cdiv(rows, tile_rows),)

    # Host-folded constants (trace-time Python floats).
    mean_f = float(mean)
    neg_half_inv_var = -0.5 / (float(std) ** 2)
    kernel = functools.partial(_gaussian_kernel, mean_f, neg_half_inv_var)

    itemsize = jnp.dtype(io_dtype).itemsize

    out2 = pl.pallas_call(
        kernel,
        grid=grid,
        in_specs=[
            pl.BlockSpec(
                (tile_rows, _LANES),
                lambda i: (i, 0),
                memory_space=pltpu.MemorySpace.VMEM,
            )
        ],
        out_specs=pl.BlockSpec(
            (tile_rows, _LANES),
            lambda i: (i, 0),
            memory_space=pltpu.MemorySpace.VMEM,
        ),
        out_shape=jax.ShapeDtypeStruct((rows, _LANES), io_dtype),
        compiler_params=pltpu.CompilerParams(
            dimension_semantics=("parallel",),
        ),
        cost_estimate=pl.CostEstimate(
            flops=int(3 * n),                    # sub + mul + scale per element
            transcendentals=int(n),              # one exp per element
            bytes_accessed=int(2 * n * itemsize),  # native-dtype in + out
        ),
    )(x2)

    if pad:
        return out2.reshape(-1)[:n].reshape(orig_shape)
    return out2.reshape(orig_shape)


def gaussian_reference(x, mean, std):
    """Pure-JAX reference matching the PyTorch forward."""
    return jnp.exp(-0.5 * ((x - mean) / std) ** 2)


if __name__ == "__main__":
    B, C, H, W = 2, 4, 16, 16
    MEAN, STD = 0.5, 1.5

    key = jax.random.PRNGKey(0)
    x = jax.random.normal(key, (B, C, H, W), jnp.float32)

    # f32 path
    y = gaussian_forward(x, MEAN, STD)
    jax.block_until_ready(y)
    y_ref = gaussian_reference(x, MEAN, STD)
    assert y.shape == x.shape and y.dtype == x.dtype
    assert jnp.allclose(y, y_ref, atol=1e-6, rtol=1e-6), "gaussian f32 mismatch"

    # bf16 path: HBM I/O stays bf16, math in f32 in-register
    x_bf16 = x.astype(jnp.bfloat16)
    y_bf16 = gaussian_forward(x_bf16, MEAN, STD)
    jax.block_until_ready(y_bf16)
    y_bf16_ref = gaussian_reference(x_bf16.astype(jnp.float32), MEAN, STD)
    assert y_bf16.dtype == jnp.bfloat16 and y_bf16.shape == x.shape
    assert jnp.allclose(y_bf16.astype(jnp.float32), y_bf16_ref, atol=2e-2), \
        "gaussian bf16 mismatch"

    print("KERNEL_OK")
</pallas_src>

<mosaic_0001>
module attributes {stable_mosaic.version = 11 : i64} {
  func.func @_gaussian_kernel(%arg0: i32, %arg1: memref<8x128xf32, #tpu.memory_space<vmem>>, %arg2: memref<8x128xf32, #tpu.memory_space<vmem>>) attributes {dimension_semantics = [#tpu.dimension_semantics<parallel>], iteration_bounds = array<i64: 2>, scalar_prefetch = 0 : i64, scratch_operands = 0 : i64, tpu.core_type = #tpu.core_type<tc>, window_params = [{transform_indices = @transform_0, window_bounds = array<i64: 8, 128>}, {transform_indices = @transform_1, window_bounds = array<i64: 8, 128>}]} {
    %c0 = arith.constant 0 : index
    %c0_0 = arith.constant 0 : index
    %0 = vector.load %arg1[%c0, %c0_0] : memref<8x128xf32, #tpu.memory_space<vmem>>, vector<8x128xf32>
    %cst = arith.constant 5.000000e-01 : f32
    %1 = vector.broadcast %cst : f32 to vector<8x128xf32>
    %2 = arith.subf %0, %1 : vector<8x128xf32>
    %3 = arith.mulf %2, %2 : vector<8x128xf32>
    %cst_1 = arith.constant -0.222222224 : f32
    %4 = vector.broadcast %cst_1 : f32 to vector<8x128xf32>
    %5 = arith.mulf %4, %3 : vector<8x128xf32>
    %6 = math.exp %5 : vector<8x128xf32>
    %c0_2 = arith.constant 0 : index
    %c0_3 = arith.constant 0 : index
    %7 = vector.load %arg2[%c0_2, %c0_3] : memref<8x128xf32, #tpu.memory_space<vmem>>, vector<8x128xf32>
    tpu.vector_store %arg2[%c0_2, %c0_3], %6 {strides = array<i32>} : memref<8x128xf32, #tpu.memory_space<vmem>>, vector<8x128xf32>,
    return
  }
  func.func @transform_0(%arg0: i32) -> (i32, i32) {
    %c0_i32 = arith.constant 0 : i32
    %c0_i32_0 = arith.constant 0 : i32
    return %arg0, %c0_i32 : i32, i32
  }
  func.func @transform_1(%arg0: i32) -> (i32, i32) {
    %c0_i32 = arith.constant 0 : i32
    %c0_i32_0 = arith.constant 0 : i32
    return %arg0, %c0_i32 : i32, i32
  }
}

</mosaic_0001>

<bundles_post_ra>
// kernel: tpu_custom_call.1
= control target key start
LH: loop header
LB: loop body
LE: loop exit
PB: predicated region body
PF: predicated region fallthrough
CT: control target
= control target key end

     0   :  { %6 = vsyncpa [#allocation3], 0  ;;  %s523_s0 = inlined_call_operand.hbm [shape: f32[16,128], index: 0, kind: input, shape index: {}]   ;;  %s524_s1 = inlined_call_operand.hbm [shape: f32[16,128], index: 1, kind: output, shape index: {}]  }
   0x1   :  { %8 = vsyncpa [#allocation3 + $0x1], 0 }
   0x2   :  { %9 = vsyncpa [#allocation4], 0 }
   0x3   :  { %11 = vsyncpa [#allocation4 + $0x1], 0  ;;  %s396_s6 = smov 0   ;;  %s398_s7 = smov 0  }
   0x4   :  { %s400_s8 = smov 0   ;;  %s402_s9 = smov 0  }
   0x5 LB: > { %s417_s10 = sadd.s32 4294967295, %s384_s9   ;;  %s227_s11 = sadd.s32 4294967294, %s384_s9   ;;  %s384_s9 = sphi %s402_s9, %s534_s9   ;;  %s380_s8 = sphi %s400_s8, %s533_s8   ;;  %s376_s7 = sphi %s398_s7, %s532_s7   ;;  %s372_s6 = sphi %s396_s6, %s531_s6  }
   0x6   : > { %s421_s12 = sadd.s32 1, %s384_s9   ;;  %s24_s13 = sadd.s32 1, %s380_s8 }
   0x7   : > { %s21_s14 = ssub.s32 %s384_s9, %s421_s12  ;;  %p31_p0 = scmp.ne.s32.totalorder %s380_s8, %s376_s7 }
   0x8   : > { %p22_p1 = scmp.eq.s32.totalorder %s21_s14, 0  ;;  %p32_p2 = scmp.eq.s32.totalorder %s384_s9, 0 }
   0x9   : > { %p37_p3 = scmp.ne.s32.totalorder %s376_s7, %s372_s6  ;;  %p38_p4 = scmp.eq.s32.totalorder %s417_s10, 0 }
   0xa   : > { %s433_s15 = scalar_select %p22_p1, %s380_s8, %s24_s13  }
   0xb   : > { %p435_p5 = por %p32_p2, %p31_p0  ;;  %p439_p6 = por %p38_p4, %p37_p3 }
   0xc   : > { %p61_p7 = scmp.eq.s32.totalorder %s417_s10, 1  ;;  %p67_p8 = scmp.eq.s32.totalorder %s227_s11, 1 }
   0xd   : > { %p252_p10 = scmp.lt.s32.totalorder %s384_s9, 2  ;;  %s87_s20 = sand.u32 1, %s380_s8  }
   0xe   : > { %p446_p11 = por %p61_p7, %p31_p0  ;;  %p450_p12 = por %p67_p8, %p37_p3 }
   0xf   : > { %s231_s21 = sshll.u32 %s384_s9, 3  ;;  %s230_s22 = sshll.u32 %s87_s20, 3 }
  0x10   : > { %s95_s25 = scalar_lea.hbm %s523_s0, %s231_s21  ;;  %s91_s27 = scalar_lea.vmem [#allocation2], %s230_s22 }
  0x11   : > { %s97_s26 = sshll.u32 %s95_s25, 4  ;;  %s99_s28 = sshll.u32 %s91_s27, 4  ;;  %s98_s26 = int_to_ptr.hbm [resolvable:$true] %s97_s26  ;;  %s100_s28 = int_to_ptr.vmem [resolvable:$true] %s99_s28 }
  0x12   : > { %p461_p13 = pnand %p252_p10, %p435_p5  ;;  %p232_p0 = scmp.ge.s32.totalorder %s384_s9, 1 }
  0x13   : > { %p104_p1 = scmp.lt.s32.totalorder %s384_s9, 3  ;;  %s88_s30 = scalar_lea.sflag [#allocation3], %s87_s20 }
  0x14   : > { %s288_s2 = sshra.s32 %s98_s26, 4  ;;  %p292_p3 = pneg %p461_p13  ;;  %s289_s2 = int_to_ptr.hbm [resolvable:$true] %s288_s2 }
  0x15   : > { %s290_s3 = scalar_lea.hbm %s289_s2, 8  ;;  %s295_s11 = scalar_lea.hbm %s523_s0, 16 }
  0x16   : > { %p291_p2 = scmp.ne.s32.totalorder %s289_s2, %s290_s3  ;;  %p296_p5 = scmp.lt.s32.totalorder %s289_s2, %s523_s0 }
  0x17   : > { %p297_p8 = scmp.lt.s32.totalorder %s295_s11, %s290_s3 }
  0x18   : > { %p293_p4 = pnand %p292_p3, %p291_p2 }
  0x19   : > { %p298_p10 = por %p297_p8, %p296_p5 }
  0x1a   : > { %p294_p7 = pneg %p293_p4 }
  0x1c   : > { %p299_p9 = pnand %p298_p10, %p294_p7 }
  0x1e   : > { %302 = shalt.err (!%p299_p9)
}
  0x1f   : > { %247 = dma.hbm_to_vmem [thread:$0]  (!%p461_p13), %s98_s26, 128, %s100_s28, %s88_s30  }
  0x20   : > { %p105_p2 = pnand %p232_p0, %p104_p1 }
  0x21   : > { %s482_s16 = sand.u32 (!%p105_p2), 1, %s376_s7  }
  0x22   : > { %108 = sbr.rel (%p105_p2) target bundleno = 59 (0x3b), region = 24  ;;  %s233_s20 = sshll.u32 (!%p105_p2), %s482_s16, 3 }
  0x23   : > { %s111_s21 = scalar_lea.sflag (!%p105_p2), [#allocation3], %s482_s16  ;;  %s114_s22 = scalar_lea.vmem (!%p105_p2), [#allocation2], %s233_s20 }
  0x27   : > { %363 = dma.done.wait (%p439_p6), %s111_s21, 128  }
  0x28   : > { %365 = vsyncadd (%p439_p6), %s111_s21, 4294967168  ;;  %v134_v0 = vld [vmem:[%s114_s22] sm:$0xff]  ;;  %s237_s23 = sshll.u32 %s417_s10, 3  ;;  %s133_s27 = scalar_lea.vmem [#allocation5], %s233_s20 }
  0x29   : > { %v235_v1 = vadd.f32 -0.5, %v134_v0  ;;  %s152_s26 = scalar_lea.hbm %s524_s1, %s237_s23  ;;  %s154_s28 = sshll.u32 %s133_s27, 4  ;;  %s155_s28 = int_to_ptr.vmem [resolvable:$true] %s154_s28 }
  0x2a   : > { %s156_s29 = sshll.u32 %s152_s26, 4  ;;  %s142_s17 = scalar_lea.sflag [#allocation4], %s482_s16  ;;  %s157_s29 = int_to_ptr.hbm [resolvable:$true] %s156_s29 }
  0x2b   : > { %v136_v2 = vmul.f32 %v235_v1, %v235_v1  ;;  %s332_s30 = sshra.s32 %s157_s29, 4  ;;  %s338_s4 = scalar_lea.hbm %s524_s1, 16  ;;  %s333_s30 = int_to_ptr.hbm [resolvable:$true] %s332_s30 }
  0x2c   : > { %s334_s2 = scalar_lea.hbm %s333_s30, 8  ;;  %p339_p0 = scmp.lt.s32.totalorder %s333_s30, %s524_s1 }
  0x2d   : > { %v137_v3 = vmul.f32 -0.22222222, %v136_v2  ;;  %p335_p6 = scmp.ne.s32.totalorder %s333_s30, %s334_s2  ;;  %p340_p1 = scmp.lt.s32.totalorder %s338_s4, %s334_s2 }
  0x2f   : > { %v138_v4 = vmul.f32 1.442695, %v137_v3  ;;  %p336_p9 = pnand %p335_p6, %p446_p11  ;;  %p341_p3 = por %p340_p1, %p339_p0 }
  0x31   : > { %286 = vpow2.f32 %v138_v4  ;;  %p337_p13 = pneg %p336_p9 }
  0x33   : > { %p342_p4 = pnand %p341_p3, %p337_p13 }
  0x37   : > { %v287_v5 = vpop.eup %286 }
  0x38   : > { %140 = vst [vmem:[%s133_s27] sm:$0xff] %v287_v5 }
  0x39   : > { %345 = shalt.err (!%p342_p4)
}
  0x3a   : > { %242 = dma.vmem_to_hbm [thread:$0]  (%p446_p11), %s155_s28, 128, %s157_s29, %s142_s17  }
  0x3b PF: > { %s168_s13 = sand.u32 1, %s372_s6   ;;  %p530_p7 = scmp.ge.s32.totalorder %s384_s9, 2 }
  0x3c   : > { %s169_s14 = scalar_lea.sflag [#allocation4], %s168_s13 }
  0x3d   : > { %p249_p5 = pnand %p530_p7, %p450_p12 }
  0x3f   : > { %p250_p8 = pneg %p249_p5 }
  0x41   : > { %367 = dma.done.wait (%p250_p8), %s169_s14, 128  }
  0x42   : > { %369 = vsyncadd (%p250_p8), %s169_s14, 4294967168  ;;  %p14_p10 = scmp.ge.s32.totalorder %s421_s12, 4   ;;  %s531_s6 = smov %s376_s7 }
  0x43   : > { %s532_s7 = smov %s380_s8  ;;  %s533_s8 = smov %s433_s15 }
  0x44   : > { %s534_s9 = smov %s421_s12  ;;  %16 = sbr.rel (!%p14_p10) target bundleno = 5 (0x5), region = 69 }
  0x49   :  { %175 = vsyncpa [#allocation3], 1 }
  0x4a   :  { %177 = vsyncpa [#allocation3 + $0x1], 1 }
  0x4b   :  { %178 = vsyncpa [#allocation4], 1 }
  0x4c   :  { %180 = vsyncpa [#allocation4 + $0x1], 1 }

</bundles_post_ra>
